<compile_context>
chip_gen: v5e
topology: v5e:2x2
jax: 0.10.0
libtpu: 0.0.40
codegen_flags: <defaults>
</compile_context>

<pallas_src>
import math

import jax
import jax.numpy as jnp
from jax.experimental import pallas as pl
from jax.experimental.pallas import tpu as pltpu


# ---------------------------------------------------------------------------
# Kernel: one (block_m, dim) row slab x one tile_h slice of the hidden dim.
#   acc += (silu(x @ w1_tile) * (x @ w3_tile)) @ w2_tile      (f32 accumulate)
#   out  = acc                                                 (at last h step)
# ---------------------------------------------------------------------------
def _ffn_kernel(x_ref, w1_ref, w3_ref, w2_ref, o_ref, acc_ref):
    h_idx = pl.program_id(1)

    @pl.when(h_idx == 0)
    def _():
        acc_ref[...] = jnp.zeros_like(acc_ref)

    x = x_ref[...]                                                # (bm, dim) bf16
    # Up-projections for this hidden tile: bf16 MXU operands, f32 accumulation.
    h1 = jnp.dot(x, w1_ref[...], preferred_element_type=jnp.float32)   # (bm, th)
    h3 = jnp.dot(x, w3_ref[...], preferred_element_type=jnp.float32)   # (bm, th)
    # SwiGLU gate in f32 (sigmoid on the EUP slot; v5e has no bf16 VPU/EUP).
    g = (h1 * jax.nn.sigmoid(h1)) * h3                            # (bm, th) f32
    # Partial down-projection, accumulated across hidden tiles in f32 scratch.
    acc_ref[...] += jnp.dot(g.astype(jnp.bfloat16), w2_ref[...],
                            preferred_element_type=jnp.float32)   # (bm, dim)

    @pl.when(h_idx == pl.num_programs(1) - 1)
    def _():
        o_ref[...] = acc_ref[...].astype(o_ref.dtype)


# ---------------------------------------------------------------------------
# Wrapper
# ---------------------------------------------------------------------------
def reasoner_feed_forward(x, w1, w2, w3, *, block_m=256, tile_h=512):
    """x: (..., dim); w1: (dim, hidden); w2: (hidden, dim); w3: (dim, hidden)."""
    orig_shape = x.shape
    out_dtype = x.dtype
    dim = orig_shape[-1]
    hidden = w1.shape[1]
    assert w1.shape == (dim, hidden) and w3.shape == (dim, hidden)
    assert w2.shape == (hidden, dim)
    # Lane-dense layout requirement (see (8,128) BlockSpec constraint).
    assert dim % 128 == 0 and hidden % 128 == 0, \
        "dim and hidden must be multiples of 128 (pad feature dims upstream)"

    x2d = x.reshape(-1, dim)
    n = x2d.shape[0]

    # bf16 MXU operands (halves HBM traffic and VMEM weight footprint).
    xb = x2d.astype(jnp.bfloat16)
    w1b = w1.astype(jnp.bfloat16)
    w2b = w2.astype(jnp.bfloat16)
    w3b = w3.astype(jnp.bfloat16)

    # Row tile: multiple of 8 sublanes, never larger than needed.
    block_m = max(8, min(block_m, ((n + 7) // 8) * 8))
    # Hidden tile: multiple of 128 lanes AND an exact divisor of hidden (the
    # hidden axis is a reduction, so padded garbage must never reach acc).
    tile_h = min(tile_h, hidden)
    if hidden % tile_h != 0:
        tile_h = math.gcd(hidden, tile_h)

    grid = (pl.cdiv(n, block_m), hidden // tile_h)

    out_itemsize = jnp.dtype(out_dtype).itemsize
    # VMEM budget for the chosen tiles (double-buffered pipelined operands,
    # f32 accumulator, f32 gate temporaries) + 50% headroom, capped at 64 MiB
    # so the same configuration is safe on v7x (64 MiB physical VMEM per TC).
    vmem_needed = (
        2 * block_m * dim * 2                 # x tile (bf16) x2 buffers
        + 2 * 2 * dim * tile_h * 2            # w1 + w3 tiles (bf16) x2 buffers
        + 2 * tile_h * dim * 2                # w2 tile (bf16) x2 buffers
        + 2 * block_m * dim * out_itemsize    # out tile x2 buffers
        + block_m * dim * 4                   # f32 accumulator scratch
        + 3 * block_m * tile_h * 4            # h1 / h3 / gate f32 temporaries
    )
    vmem_limit = min(64 * 1024 * 1024,
                     max(32 * 1024 * 1024, int(1.5 * vmem_needed)))

    cost = pl.CostEstimate(
        flops=6 * n * dim * hidden,           # 2 up-proj + 1 down-proj matmuls
        transcendentals=n * hidden,           # sigmoid
        bytes_accessed=(xb.size * 2
                        + (w1b.size + w2b.size + w3b.size) * 2
                        + n * dim * out_itemsize),
    )

    # TODO(synk): verify the "parallel" M axis shards across both v7x
    # TensorCores in xprof; if not, switch to pltpu.CORE_PARALLEL / core_map.
    out = pl.pallas_call(
        _ffn_kernel,
        out_shape=jax.ShapeDtypeStruct((n, dim), out_dtype),
        grid=grid,
        in_specs=[
            pl.BlockSpec((block_m, dim), lambda i, h: (i, 0)),   # x rows
            pl.BlockSpec((dim, tile_h), lambda i, h: (0, h)),    # w1 tile
            pl.BlockSpec((dim, tile_h), lambda i, h: (0, h)),    # w3 tile
            pl.BlockSpec((tile_h, dim), lambda i, h: (h, 0)),    # w2 tile
        ],
        out_specs=pl.BlockSpec((block_m, dim), lambda i, h: (i, 0)),
        scratch_shapes=[pltpu.VMEM((block_m, dim), jnp.float32)],
        compiler_params=pltpu.CompilerParams(
            dimension_semantics=("parallel", "arbitrary"),
            vmem_limit_bytes=vmem_limit),
        cost_estimate=cost,
    )(xb, w1b, w3b, w2b)
    return out.reshape(orig_shape)


# ---------------------------------------------------------------------------
# Module construction helpers (mirror the torch __init__ exactly)
# ---------------------------------------------------------------------------
def compute_hidden_dim(dim, hidden_dim, multiple_of, ffn_dim_multiplier):
    hidden_dim = int(2 * hidden_dim / 3)
    if ffn_dim_multiplier is not None:
        hidden_dim = int(ffn_dim_multiplier * hidden_dim)
    hidden_dim = multiple_of * ((hidden_dim + multiple_of - 1) // multiple_of)
    return hidden_dim


def init_params(key, dim, hidden_dim, multiple_of, ffn_dim_multiplier):
    h = compute_hidden_dim(dim, hidden_dim, multiple_of, ffn_dim_multiplier)
    k1, k2, k3 = jax.random.split(key, 3)
    scale = 0.02
    # Stored as (in, out) == torch weight transposed; nn.Linear(bias=False).
    return {
        "w1": jax.random.normal(k1, (dim, h), jnp.float32) * scale,
        "w2": jax.random.normal(k2, (h, dim), jnp.float32) * scale,
        "w3": jax.random.normal(k3, (dim, h), jnp.float32) * scale,
    }


def reference_ffn_f32(x, p):
    h1 = x @ p["w1"]
    h3 = x @ p["w3"]
    return (jax.nn.silu(h1) * h3) @ p["w2"]


def reference_ffn_bf16(x, p):
    """Mirrors the kernel math exactly: bf16 operands, f32 accumulation."""
    xb = x.astype(jnp.bfloat16)
    w1 = p["w1"].astype(jnp.bfloat16)
    w2 = p["w2"].astype(jnp.bfloat16)
    w3 = p["w3"].astype(jnp.bfloat16)
    h1 = jnp.dot(xb, w1, preferred_element_type=jnp.float32)
    h3 = jnp.dot(xb, w3, preferred_element_type=jnp.float32)
    g = (h1 * jax.nn.sigmoid(h1)) * h3
    return jnp.dot(g.astype(jnp.bfloat16), w2,
                   preferred_element_type=jnp.float32).astype(x.dtype)


# ---------------------------------------------------------------------------
if __name__ == "__main__":
    key = jax.random.PRNGKey(0)
    pkey, xkey, ykey = jax.random.split(key, 3)

    # dim=128, hidden_dim arg=512, multiple_of=128 -> internal hidden = 384
    DIM, HIDDEN_ARG, MULTIPLE_OF, FFN_MULT = 128, 512, 128, None
    params = init_params(pkey, DIM, HIDDEN_ARG, MULTIPLE_OF, FFN_MULT)

    # Path 1: tiny batch (2, 8, 128) -> grid (1, 1), everything VMEM-resident.
    x_small = jax.random.normal(xkey, (2, 8, DIM), jnp.float32)
    out_small = reasoner_feed_forward(x_small, params["w1"], params["w2"],
                                      params["w3"])
    jax.block_until_ready(out_small)
    assert out_small.shape == x_small.shape and out_small.dtype == jnp.float32
    assert jnp.allclose(out_small, reference_ffn_bf16(x_small, params),
                        atol=2e-3, rtol=2e-3)
    # Loose sanity vs the full-f32 torch-equivalent reference (bf16 operands).
    assert jnp.allclose(out_small, reference_ffn_f32(x_small, params),
                        atol=3e-2, rtol=3e-2)

    # Path 2: larger M (N=320 rows -> 2 row blocks, last one partial / masked)
    # with tile_h=128 -> 3 hidden-reduction steps exercising the accumulator.
    x_big = jax.random.normal(ykey, (4, 80, DIM), jnp.float32)
    out_big = reasoner_feed_forward(x_big, params["w1"], params["w2"],
                                    params["w3"], block_m=256, tile_h=128)
    jax.block_until_ready(out_big)
    assert out_big.shape == x_big.shape
    assert jnp.allclose(out_big, reference_ffn_bf16(x_big, params),
                        atol=2e-3, rtol=2e-3)

    print("KERNEL_OK")
</pallas_src>

<mosaic_0001>
module attributes {stable_mosaic.version = 11 : i64} {
  func.func @_ffn_kernel(%arg0: i32, %arg1: i32, %arg2: memref<16x128xbf16, #tpu.memory_space<vmem>>, %arg3: memref<128x384xbf16, #tpu.memory_space<vmem>>, %arg4: memref<128x384xbf16, #tpu.memory_space<vmem>>, %arg5: memref<384x128xbf16, #tpu.memory_space<vmem>>, %arg6: memref<16x128xf32, #tpu.memory_space<vmem>>, %arg7: memref<16x128xf32, #tpu.memory_space<vmem>>) attributes {dimension_semantics = [#tpu.dimension_semantics<parallel>, #tpu.dimension_semantics<arbitrary>], iteration_bounds = array<i64: 1, 1>, scalar_prefetch = 0 : i64, scratch_operands = 1 : i64, tpu.core_type = #tpu.core_type<tc>, window_params = [{transform_indices = @transform_0, window_bounds = array<i64: 16, 128>}, {transform_indices = @transform_1, window_bounds = array<i64: 128, 384>}, {transform_indices = @transform_2, window_bounds = array<i64: 128, 384>}, {transform_indices = @transform_3, window_bounds = array<i64: 384, 128>}, {transform_indices = @transform_4, window_bounds = array<i64: 16, 128>}]} {
    %c0_i32 = arith.constant 0 : i32
    %0 = arith.cmpi eq, %arg1, %c0_i32 : i32
    %1 = arith.extui %0 : i1 to i32
    %c0_i32_0 = arith.constant 0 : i32
    %2 = arith.cmpi ne, %1, %c0_i32_0 : i32
    scf.if %2 {
      %cst_17 = arith.constant 0.000000e+00 : f32
      %24 = vector.broadcast %cst_17 : f32 to vector<16x128xf32>
      %c0_18 = arith.constant 0 : index
      %c0_19 = arith.constant 0 : index
      %25 = vector.load %arg7[%c0_18, %c0_19] : memref<16x128xf32, #tpu.memory_space<vmem>>, vector<16x128xf32>
      tpu.vector_store %arg7[%c0_18, %c0_19], %24 {strides = array<i32>} : memref<16x128xf32, #tpu.memory_space<vmem>>, vector<16x128xf32>,
    } else {
    }
    %c0 = arith.constant 0 : index
    %c0_1 = arith.constant 0 : index
    %3 = vector.load %arg2[%c0, %c0_1] : memref<16x128xbf16, #tpu.memory_space<vmem>>, vector<16x128xbf16>
    %c0_2 = arith.constant 0 : index
    %c0_3 = arith.constant 0 : index
    %4 = vector.load %arg3[%c0_2, %c0_3] : memref<128x384xbf16, #tpu.memory_space<vmem>>, vector<128x384xbf16>
    %cst = arith.constant dense<0.000000e+00> : vector<16x384xf32>
    %5 = tpu.matmul %3, %4, %cst {dimension_numbers = #tpu.dot_dimension_numbers<[1], [0], [0], [1], [0, 0, 1, 1], [], []>} : vector<16x128xbf16>, vector<128x384xbf16>, vector<16x384xf32> -> vector<16x384xf32>
    %c0_4 = arith.constant 0 : index
    %c0_5 = arith.constant 0 : index
    %6 = vector.load %arg4[%c0_4, %c0_5] : memref<128x384xbf16, #tpu.memory_space<vmem>>, vector<128x384xbf16>
    %cst_6 = arith.constant dense<0.000000e+00> : vector<16x384xf32>
    %7 = tpu.matmul %3, %6, %cst_6 {dimension_numbers = #tpu.dot_dimension_numbers<[1], [0], [0], [1], [0, 0, 1, 1], [], []>} : vector<16x128xbf16>, vector<128x384xbf16>, vector<16x384xf32> -> vector<16x384xf32>
    %8 = arith.negf %5 : vector<16x384xf32>
    %9 = math.exp %8 : vector<16x384xf32>
    %cst_7 = arith.constant 1.000000e+00 : f32
    %10 = vector.broadcast %cst_7 : f32 to vector<16x384xf32>
    %11 = arith.addf %10, %9 : vector<16x384xf32>
    %12 = arith.divf %10, %11 : vector<16x384xf32>
    %13 = arith.mulf %5, %12 : vector<16x384xf32>
    %14 = arith.mulf %13, %7 : vector<16x384xf32>
    %c0_8 = arith.constant 0 : index
    %c0_9 = arith.constant 0 : index
    %15 = vector.load %arg7[%c0_8, %c0_9] : memref<16x128xf32, #tpu.memory_space<vmem>>, vector<16x128xf32>
    %16 = arith.truncf %14 : vector<16x384xf32> to vector<16x384xbf16>
    %c0_10 = arith.constant 0 : index
    %c0_11 = arith.constant 0 : index
    %17 = vector.load %arg5[%c0_10, %c0_11] : memref<384x128xbf16, #tpu.memory_space<vmem>>, vector<384x128xbf16>
    %cst_12 = arith.constant dense<0.000000e+00> : vector<16x128xf32>
    %18 = tpu.matmul %16, %17, %cst_12 {dimension_numbers = #tpu.dot_dimension_numbers<[1], [0], [0], [1], [0, 0, 1, 1], [], []>} : vector<16x384xbf16>, vector<384x128xbf16>, vector<16x128xf32> -> vector<16x128xf32>
    %19 = arith.addf %15, %18 : vector<16x128xf32>
    %c0_13 = arith.constant 0 : index
    %c0_14 = arith.constant 0 : index
    %20 = vector.load %arg7[%c0_13, %c0_14] : memref<16x128xf32, #tpu.memory_space<vmem>>, vector<16x128xf32>
    tpu.vector_store %arg7[%c0_13, %c0_14], %19 {strides = array<i32>} : memref<16x128xf32, #tpu.memory_space<vmem>>, vector<16x128xf32>,
    %c0_i32_15 = arith.constant 0 : i32
    %21 = arith.cmpi eq, %arg1, %c0_i32_15 : i32
    %22 = arith.extui %21 : i1 to i32
    %c0_i32_16 = arith.constant 0 : i32
    %23 = arith.cmpi ne, %22, %c0_i32_16 : i32
    scf.if %23 {
      %c0_17 = arith.constant 0 : index
      %c0_18 = arith.constant 0 : index
      %24 = vector.load %arg7[%c0_17, %c0_18] : memref<16x128xf32, #tpu.memory_space<vmem>>, vector<16x128xf32>
      %c0_19 = arith.constant 0 : index
      %c0_20 = arith.constant 0 : index
      %25 = vector.load %arg6[%c0_19, %c0_20] : memref<16x128xf32, #tpu.memory_space<vmem>>, vector<16x128xf32>
      tpu.vector_store %arg6[%c0_19, %c0_20], %24 {strides = array<i32>} : memref<16x128xf32, #tpu.memory_space<vmem>>, vector<16x128xf32>,
    } else {
    }
    return
  }
  func.func @transform_0(%arg0: i32, %arg1: i32) -> (i32, i32) {
    %c0_i32 = arith.constant 0 : i32
    %c0_i32_0 = arith.constant 0 : i32
    return %arg0, %c0_i32 : i32, i32
  }
  func.func @transform_1(%arg0: i32, %arg1: i32) -> (i32, i32) {
    %c0_i32 = arith.constant 0 : i32
    %c0_i32_0 = arith.constant 0 : i32
    return %c0_i32, %arg1 : i32, i32
  }
  func.func @transform_2(%arg0: i32, %arg1: i32) -> (i32, i32) {
    %c0_i32 = arith.constant 0 : i32
    %c0_i32_0 = arith.constant 0 : i32
    return %c0_i32, %arg1 : i32, i32
  }
  func.func @transform_3(%arg0: i32, %arg1: i32) -> (i32, i32) {
    %c0_i32 = arith.constant 0 : i32
    %c0_i32_0 = arith.constant 0 : i32
    return %arg1, %c0_i32 : i32, i32
  }
  func.func @transform_4(%arg0: i32, %arg1: i32) -> (i32, i32) {
    %c0_i32 = arith.constant 0 : i32
    %c0_i32_0 = arith.constant 0 : i32
    return %arg0, %c0_i32 : i32, i32
  }
}

</mosaic_0001>

<bundles_post_ra>
// kernel: tpu_custom_call.1
= control target key start
LH: loop header
LB: loop body
LE: loop exit
PB: predicated region body
PF: predicated region fallthrough
CT: control target
= control target key end

     0   :  { %9 = vsyncpa [#allocation4], 0  ;;  %s1608_s0 = inlined_call_operand.hbm [shape: bf16[16,128], index: 0, kind: input, shape index: {}]   ;;  %s1609_s1 = inlined_call_operand.hbm [shape: bf16[128,384], index: 1, kind: input, shape index: {}]   ;;  %s1610_s2 = inlined_call_operand.hbm [shape: bf16[128,384], index: 2, kind: input, shape index: {}]   ;;  %s1611_s3 = inlined_call_operand.hbm [shape: bf16[384,128], index: 3, kind: input, shape index: {}]   ;;  %s1612_s4 = inlined_call_operand.hbm [shape: f32[16,128], index: 4, kind: output, shape index: {}]  }
   0x1   :  { %10 = vsyncpa [#allocation7], 0 }
   0x2   :  { %11 = vsyncpa [#allocation10], 0  ;;  %s30_s17 = sshll.u32 %s1609_s1, 4  ;;  %s31_s17 = int_to_ptr.hbm [resolvable:$true] %s30_s17 }
   0x3   :  { %12 = vsyncpa [#allocation5], 0  ;;  %s1430_s18 = smov [#allocation6]   ;;  %s17_s22 = sshll.u32 %s1608_s0, 4  ;;  %s18_s22 = int_to_ptr.hbm [resolvable:$true] %s17_s22 }
   0x4   :  { %s32_s19 = sshll.u32 %s1430_s18, 4  ;;  %s1431_s23 = smov 192   ;;  %s33_s19 = int_to_ptr.vmem [resolvable:$true] %s32_s19 }
   0x5   :  { %s1432_s24 = smov 12   ;;  %s1433_s25 = smov [#allocation3]  }
   0x6   :  { %38 = dma.hbm_to_vmem [thread:$0]  %s31_s17, 3072, %s33_s19, [#allocation7], %s1431_s23, %s1431_s23, %s1432_s24  }
   0x7   :  { %s19_s26 = sshll.u32 %s1433_s25, 4  ;;  %s1434_s27 = smov 64   ;;  %s20_s26 = int_to_ptr.vmem [resolvable:$true] %s19_s26 }
   0x8   :  { %s1435_s28 = smov 4   ;;  %s43_s30 = sshll.u32 %s1610_s2, 4  ;;  %s44_s30 = int_to_ptr.hbm [resolvable:$true] %s43_s30 }
   0x9   :  { %25 = dma.hbm_to_vmem [thread:$0]  %s18_s22, 128, %s20_s26, [#allocation4], %s1434_s27, %s1434_s27, %s1435_s28  }
   0xa   :  { %s1436_s5 = smov [#allocation8]   ;;  %s56_s8 = sshll.u32 %s1611_s3, 4  ;;  %s57_s8 = int_to_ptr.hbm [resolvable:$true] %s56_s8 }
   0xb   :  { %s45_s6 = sshll.u32 %s1436_s5, 4  ;;  %s1437_s9 = smov [#allocation9]   ;;  %s46_s6 = int_to_ptr.vmem [resolvable:$true] %s45_s6 }
   0xc   :  { %51 = dma.hbm_to_vmem [thread:$0]  %s44_s30, 3072, %s46_s6, [#allocation7], %s1431_s23, %s1431_s23, %s1432_s24  }
   0xd   :  { %s58_s10 = sshll.u32 %s1437_s9, 4  ;;  %s59_s10 = int_to_ptr.vmem [resolvable:$true] %s58_s10 }
   0xe   :  { %64 = dma.hbm_to_vmem [thread:$0]  %s57_s8, 3072, %s59_s10, [#allocation10], %s1434_s27, %s1434_s27, %s1435_s28  }
   0xf   :  { %1422 = dma.done.wait [#allocation4], 128  }
  0x10   :  { %1423 = vsyncadd [#allocation4], 4294967168 }
  0x11   :  { %1424 = dma.done.wait [#allocation7], 6144  }
  0x12   :  { %1425 = vsyncadd [#allocation7], 4294961152 }
  0x13   :  { %1426 = dma.done.wait [#allocation10], 3072  }
  0x14   :  { %1427 = vsyncadd [#allocation10], 4294964224  ;;  %v986_v0 = vld [vmem:[#allocation6 + $0xa8] sm:$0xf]  ;;  %v1217_v1 = vld [vmem:[#allocation6 + $0xb0] sm:$0xf0] }
  0x15   :  { %v1216_v2 = vld [vmem:[#allocation6 + $0xac] sm:$0xf]  ;;  %v987_v3 = vor.u32 %v1217_v1, %v986_v0  ;;  %v988_v4 = vld [vmem:[#allocation6 + $0xb4] sm:$0xf0]  ;;  %v994_v5 = vld [vmem:[#allocation6 + $0xb0] sm:$0xf] }
  0x16   :  { %v1218_v6 = vld [vmem:[#allocation6 + $0xb8] sm:$0xf0]  ;;  %v991_v7 = vor.u32 %v1216_v2, %v988_v4  ;;  %v974_v9 = vld [vmem:[#allocation6 + $0x90] sm:$0xf]  ;;  %v1213_v11 = vld [vmem:[#allocation6 + $0x94] sm:$0xf] }
  0x17   :  { %v995_v8 = vor.u32 %v1218_v6, %v994_v5  ;;  %v1214_v10 = vld [vmem:[#allocation6 + $0x98] sm:$0xf0]  ;;  %255 = vmatpush.bf16.msra.mxu0 %v987_v3  ;;  %v976_v13 = vld [vmem:[#allocation6 + $0x9c] sm:$0xf0]  ;;  %v982_v14 = vld [vmem:[#allocation6 + $0x98] sm:$0xf] }
  0x18   :  { %v975_v12 = vor.u32 %v1214_v10, %v974_v9  ;;  %v1215_v15 = vld [vmem:[#allocation6 + $0xa0] sm:$0xf0]  ;;  %269 = vmatpush.bf16.msra.mxu1 %v991_v7  ;;  %v979_v16 = vor.u32 %v1213_v11, %v976_v13  ;;  %v962_v18 = vld [vmem:[#allocation6 + $0x78] sm:$0xf]  ;;  %v1210_v20 = vld [vmem:[#allocation6 + $0x7c] sm:$0xf] }
  0x19   :  { %283 = vmatpush.bf16.msra.mxu2 %v995_v8  ;;  %v983_v17 = vor.u32 %v1215_v15, %v982_v14  ;;  %v1211_v19 = vld [vmem:[#allocation6 + $0x80] sm:$0xf0]  ;;  %v964_v21 = vld [vmem:[#allocation6 + $0x84] sm:$0xf0]  ;;  %v970_v22 = vld [vmem:[#allocation6 + $0x80] sm:$0xf] }
  0x1a   :  { %v1212_v23 = vld [vmem:[#allocation6 + $0x88] sm:$0xf0]  ;;  %v963_v24 = vor.u32 %v1211_v19, %v962_v18  ;;  %v967_v25 = vor.u32 %v1210_v20, %v964_v21  ;;  %v950_v27 = vld [vmem:[#allocation6 + $0x60] sm:$0xf]  ;;  %v1207_v29 = vld [vmem:[#allocation6 + $0x64] sm:$0xf] }
  0x1b   :  { %256 = vmatpush.bf16.msra.mxu0 %v975_v12  ;;  %v971_v26 = vor.u32 %v1212_v23, %v970_v22  ;;  %v1208_v28 = vld [vmem:[#allocation6 + $0x68] sm:$0xf0]  ;;  %v952_v30 = vld [vmem:[#allocation6 + $0x6c] sm:$0xf0]  ;;  %v958_v31 = vld [vmem:[#allocation6 + $0x68] sm:$0xf] }
  0x1c   :  { %270 = vmatpush.bf16.msra.mxu1 %v979_v16  ;;  %v1209_v32 = vld [vmem:[#allocation6 + $0x70] sm:$0xf0]  ;;  %v1082_v33 = vld [vmem:[#allocation8 + $0xa8] sm:$0xf]  ;;  %v951_v35 = vor.u32 %v1208_v28, %v950_v27  ;;  %v955_v39 = vor.u32 %v1207_v29, %v952_v30  ;;  %v1204_v41 = vld [vmem:[#allocation6 + $0x4c] sm:$0xf] }
  0x1d   :  { %284 = vmatpush.bf16.msra.mxu2 %v983_v17  ;;  %v1241_v34 = vld [vmem:[#allocation8 + $0xb0] sm:$0xf0]  ;;  %v938_v36 = vld [vmem:[#allocation6 + $0x48] sm:$0xf]  ;;  %v959_v40 = vor.u32 %v1209_v32, %v958_v31  ;;  %v940_v42 = vld [vmem:[#allocation6 + $0x54] sm:$0xf0] }
  0x1e   :  { %v1205_v37 = vld [vmem:[#allocation6 + $0x50] sm:$0xf0]  ;;  %v1083_v38 = vor.u32 %v1241_v34, %v1082_v33  ;;  %v1070_v43 = vld [vmem:[#allocation8 + $0x90] sm:$0xf]  ;;  %v1206_v45 = vld [vmem:[#allocation6 + $0x58] sm:$0xf0]  ;;  %v943_v51 = vor.u32 %v1204_v41, %v940_v42 }
  0x1f   :  { %257 = vmatpush.bf16.msra.mxu0 %v963_v24  ;;  %v946_v44 = vld [vmem:[#allocation6 + $0x50] sm:$0xf]  ;;  %v1238_v46 = vld [vmem:[#allocation8 + $0x98] sm:$0xf0]  ;;  %v939_v48 = vor.u32 %v1205_v37, %v938_v36  ;;  %v1058_v49 = vld [vmem:[#allocation8 + $0x78] sm:$0xf] }
  0x20   :  { %271 = vmatpush.bf16.msra.mxu1 %v967_v25  ;;  %457 = vmatpush.bf16.msra.mxu3 %v1083_v38  ;;  %v1071_v47 = vor.u32 %v1238_v46, %v1070_v43  ;;  %v1235_v50 = vld [vmem:[#allocation8 + $0x80] sm:$0xf0]  ;;  %v947_v52 = vor.u32 %v1206_v45, %v946_v44  ;;  %v926_v53 = vld [vmem:[#allocation6 + $0x30] sm:$0xf]  ;;  %v1202_v54 = vld [vmem:[#allocation6 + $0x38] sm:$0xf0] }
  0x21   :  { %285 = vmatpush.bf16.msra.mxu2 %v971_v26  ;;  %v1201_v55 = vld [vmem:[#allocation6 + $0x34] sm:$0xf]  ;;  %v928_v56 = vld [vmem:[#allocation6 + $0x3c] sm:$0xf0]  ;;  %v934_v57 = vld [vmem:[#allocation6 + $0x38] sm:$0xf]  ;;  %v1059_v59 = vor.u32 %v1235_v50, %v1058_v49  ;;  %v927_v62 = vor.u32 %v1202_v54, %v926_v53 }
  0x22   :  { %v1203_v58 = vld [vmem:[#allocation6 + $0x40] sm:$0xf0]  ;;  %v1046_v60 = vld [vmem:[#allocation8 + $0x60] sm:$0xf]  ;;  %v1232_v61 = vld [vmem:[#allocation8 + $0x68] sm:$0xf0]  ;;  %v931_v63 = vor.u32 %v1201_v55, %v928_v56 }
  0x23   :  { %258 = vmatpush.bf16.msra.mxu0 %v951_v35  ;;  %v935_v0 = vor.u32 %v1203_v58, %v934_v57  ;;  %v914_v1 = vld [vmem:[#allocation6 + $0x18] sm:$0xf]  ;;  %v1199_v2 = vld [vmem:[#allocation6 + $0x20] sm:$0xf0]  ;;  %v1198_v3 = vld [vmem:[#allocation6 + $0x1c] sm:$0xf]  ;;  %v1047_v7 = vor.u32 %v1232_v61, %v1046_v60 }
  0x24   :  { %272 = vmatpush.bf16.msra.mxu1 %v955_v39  ;;  %458 = vmatpush.bf16.msra.mxu3 %v1071_v47  ;;  %v916_v4 = vld [vmem:[#allocation6 + $0x24] sm:$0xf0]  ;;  %v922_v5 = vld [vmem:[#allocation6 + $0x20] sm:$0xf]  ;;  %v1200_v6 = vld [vmem:[#allocation6 + $0x28] sm:$0xf0]  ;;  %v915_v10 = vor.u32 %v1199_v2, %v914_v1 }
  0x25   :  { %286 = vmatpush.bf16.msra.mxu2 %v959_v40  ;;  %v1034_v8 = vld [vmem:[#allocation8 + $0x48] sm:$0xf]  ;;  %v1229_v9 = vld [vmem:[#allocation8 + $0x50] sm:$0xf0]  ;;  %v902_v11 = vld [vmem:[#allocation6] sm:$0xf]  ;;  %v919_v12 = vor.u32 %v1198_v3, %v916_v4  ;;  %v923_v13 = vor.u32 %v1200_v6, %v922_v5 }
  0x26   :  { %v1196_v14 = vld [vmem:[#allocation6 + $0x8] sm:$0xf0]  ;;  %v1195_v15 = vld [vmem:[#allocation6 + $0x4] sm:$0xf]  ;;  %v904_v16 = vld [vmem:[#allocation6 + $0xc] sm:$0xf0]  ;;  %v1035_v20 = vor.u32 %v1229_v9, %v1034_v8 }
  0x27   :  { %259 = vmatpush.bf16.msra.mxu0 %v939_v48  ;;  %v910_v17 = vld [vmem:[#allocation6 + $0x8] sm:$0xf]  ;;  %v1197_v18 = vld [vmem:[#allocation6 + $0x10] sm:$0xf0]  ;;  %v1240_v19 = vld [vmem:[#allocation8 + $0xac] sm:$0xf]  ;;  %v903_v24 = vor.u32 %v1196_v14, %v902_v11  ;;  %v907_v27 = vor.u32 %v1195_v15, %v904_v16 }
  0x28   :  { %273 = vmatpush.bf16.msra.mxu1 %v943_v51  ;;  %459 = vmatpush.bf16.msra.mxu3 %v1059_v59  ;;  %v1084_v21 = vld [vmem:[#allocation8 + $0xb4] sm:$0xf0]  ;;  %v1090_v22 = vld [vmem:[#allocation8 + $0xb0] sm:$0xf]  ;;  %v1242_v23 = vld [vmem:[#allocation8 + $0xb8] sm:$0xf0]  ;;  %v911_v28 = vor.u32 %v1197_v18, %v910_v17 }
  0x29   :  { %287 = vmatpush.bf16.msra.mxu2 %v947_v52  ;;  %v1022_v25 = vld [vmem:[#allocation8 + $0x30] sm:$0xf]  ;;  %v1226_v26 = vld [vmem:[#allocation8 + $0x38] sm:$0xf0]  ;;  %v1087_v29 = vor.u32 %v1240_v19, %v1084_v21  ;;  %v1091_v30 = vor.u32 %v1242_v23, %v1090_v22  ;;  %v1237_v32 = vld [vmem:[#allocation8 + $0x94] sm:$0xf] }
  0x2a   :  { %v1478_v31 = vld [vmem:[#allocation3] sm:$0xff]  ;;  %v1072_v33 = vld [vmem:[#allocation8 + $0x9c] sm:$0xf0]  ;;  %v1239_v35 = vld [vmem:[#allocation8 + $0xa0] sm:$0xf0]  ;;  %v1023_v36 = vor.u32 %v1226_v26, %v1022_v25  ;;  %s1438_s2 = smov [#allocation11]  }
  0x2b   :  { %260 = vmatpush.bf16.msra.mxu0 %v927_v62  ;;  %v1078_v34 = vld [vmem:[#allocation8 + $0x98] sm:$0xf]  ;;  %v1223_v38 = vld [vmem:[#allocation8 + $0x20] sm:$0xf0]  ;;  %v1075_v39 = vor.u32 %v1237_v32, %v1072_v33  ;;  %v1234_v41 = vld [vmem:[#allocation8 + $0x7c] sm:$0xf] }
  0x2c   :  { %274 = vmatpush.bf16.msra.mxu1 %v931_v63  ;;  %460 = vmatpush.bf16.msra.mxu3 %v1047_v7  ;;  %v1010_v37 = vld [vmem:[#allocation8 + $0x18] sm:$0xf]  ;;  %v1079_v40 = vor.u32 %v1239_v35, %v1078_v34  ;;  %v1060_v42 = vld [vmem:[#allocation8 + $0x84] sm:$0xf0]  ;;  %v1066_v43 = vld [vmem:[#allocation8 + $0x80] sm:$0xf] }
  0x2d   :  { %288 = vmatpush.bf16.msra.mxu2 %v935_v0  ;;  %v1236_v44 = vld [vmem:[#allocation8 + $0x88] sm:$0xf0]  ;;  %v1011_v45 = vor.u32 %v1223_v38, %v1010_v37  ;;  %v998_v46 = vld [vmem:[#allocation8] sm:$0xf]  ;;  %v1063_v48 = vor.u32 %v1234_v41, %v1060_v42  ;;  %v1231_v50 = vld [vmem:[#allocation8 + $0x64] sm:$0xf] }
  0x2e   :  { %v1220_v47 = vld [vmem:[#allocation8 + $0x8] sm:$0xf0]  ;;  %v1067_v49 = vor.u32 %v1236_v44, %v1066_v43  ;;  %v1048_v51 = vld [vmem:[#allocation8 + $0x6c] sm:$0xf0]  ;;  %v1054_v52 = vld [vmem:[#allocation8 + $0x68] sm:$0xf] }
  0x2f   :  { %261 = vmatpush.bf16.msra.mxu0 %v915_v10  ;;  %v1233_v53 = vld [vmem:[#allocation8 + $0x70] sm:$0xf0]  ;;  %v999_v54 = vor.u32 %v1220_v47, %v998_v46  ;;  %v1051_v55 = vor.u32 %v1231_v50, %v1048_v51  ;;  %v1228_v57 = vld [vmem:[#allocation8 + $0x4c] sm:$0xf]  ;;  %v1036_v58 = vld [vmem:[#allocation8 + $0x54] sm:$0xf0] }
  0x30   :  { %275 = vmatpush.bf16.msra.mxu1 %v919_v12  ;;  %461 = vmatpush.bf16.msra.mxu3 %v1035_v20  ;;  %v1055_v56 = vor.u32 %v1233_v53, %v1054_v52  ;;  %v1042_v59 = vld [vmem:[#allocation8 + $0x50] sm:$0xf]  ;;  %v1230_v60 = vld [vmem:[#allocation8 + $0x58] sm:$0xf0]  ;;  %v1039_v61 = vor.u32 %v1228_v57, %v1036_v58  ;;  %v1225_v63 = vld [vmem:[#allocation8 + $0x34] sm:$0xf] }
  0x31   :  { %289 = vmatpush.bf16.msra.mxu2 %v923_v13  ;;  %v1043_v62 = vor.u32 %v1230_v60, %v1042_v59  ;;  %v1024_v0 = vld [vmem:[#allocation8 + $0x3c] sm:$0xf0]  ;;  %v1030_v1 = vld [vmem:[#allocation8 + $0x38] sm:$0xf]  ;;  %v1227_v2 = vld [vmem:[#allocation8 + $0x40] sm:$0xf0] }
  0x32   :  { %v1027_v3 = vor.u32 %v1225_v63, %v1024_v0  ;;  %v1031_v4 = vor.u32 %v1227_v2, %v1030_v1  ;;  %v1222_v5 = vld [vmem:[#allocation8 + $0x1c] sm:$0xf]  ;;  %v1012_v6 = vld [vmem:[#allocation8 + $0x24] sm:$0xf0]  ;;  %v1018_v7 = vld [vmem:[#allocation8 + $0x20] sm:$0xf] }
  0x33   :  { %262 = vmatpush.bf16.msra.mxu0 %v903_v24  ;;  %v1224_v8 = vld [vmem:[#allocation8 + $0x28] sm:$0xf0]  ;;  %v1015_v9 = vor.u32 %v1222_v5, %v1012_v6  ;;  %v1219_v11 = vld [vmem:[#allocation8 + $0x4] sm:$0xf]  ;;  %v1000_v12 = vld [vmem:[#allocation8 + $0xc] sm:$0xf0] }
  0x34   :  { %276 = vmatpush.bf16.msra.mxu1 %v907_v27  ;;  %462 = vmatpush.bf16.msra.mxu3 %v1023_v36  ;;  %v1019_v10 = vor.u32 %v1224_v8, %v1018_v7  ;;  %v1006_v13 = vld [vmem:[#allocation8 + $0x8] sm:$0xf]  ;;  %v1221_v14 = vld [vmem:[#allocation8 + $0x10] sm:$0xf0]  ;;  %v1003_v15 = vor.u32 %v1219_v11, %v1000_v12  ;;  %v1250_v17 = vld [vmem:[#allocation9 + $0x38] sm:$0xff]  ;;  %s879_s3 = sshll.u32 %s1438_s2, 4  ;;  %s880_s3 = int_to_ptr.vmem [resolvable:$true] %s879_s3 }
  0x35   :  { %290 = vmatpush.bf16.msra.mxu2 %v911_v28  ;;  %v1007_v16 = vor.u32 %v1221_v14, %v1006_v13  ;;  %v1258_v18 = vld [vmem:[#allocation9 + $0x78] sm:$0xff]  ;;  %v1249_v19 = vld [vmem:[#allocation9 + $0x30] sm:$0xff]  ;;  %v1248_v22 = vld [vmem:[#allocation9 + $0x28] sm:$0xff]  ;;  %s881_s13 = sshll.u32 %s1612_s4, 4  ;;  %s1439_s14 = smov 128   ;;  %s882_s13 = int_to_ptr.hbm [resolvable:$true] %s881_s13 }
  0x36   :  { %263 = vmatmul.bf16.vlgmr.msra.gmra.mxu0 %v1478_v31  ;;  %v1257_v20 = vld [vmem:[#allocation9 + $0x70] sm:$0xff]  ;;  %v1266_v21 = vld [vmem:[#allocation9 + $0xb8] sm:$0xff]  ;;  %v1256_v23 = vld [vmem:[#allocation9 + $0x68] sm:$0xff]  ;;  %s1440_s15 = smov 8  }
  0x37   :  { %471 = vmatpush.bf16.msrb.mxu0 %v1087_v29  ;;  %277 = vmatmul.bf16.vlgmr.msra.gmra.mxu1 %v1478_v31  ;;  %v1265_v24 = vld [vmem:[#allocation9 + $0xb0] sm:$0xff]  ;;  %v1247_v25 = vld [vmem:[#allocation9 + $0x20] sm:$0xff]  ;;  %v1264_v27 = vld [vmem:[#allocation9 + $0xa8] sm:$0xff] }
  0x38   :  { %485 = vmatpush.bf16.msrb.mxu1 %v1091_v30  ;;  %291 = vmatmul.bf16.vlgmr.msra.gmra.mxu2 %v1478_v31  ;;  %v1255_v26 = vld [vmem:[#allocation9 + $0x60] sm:$0xff]  ;;  %v1254_v32 = vld [vmem:[#allocation9 + $0x58] sm:$0xff]  ;;  %v1245_v35 = vld [vmem:[#allocation9 + $0x10] sm:$0xff] }
  0x39   :  { %463 = vmatpush.bf16.msra.mxu3 %v1011_v45  ;;  %822 = vmatpush.bf16.msrb.mxu2 %v1250_v17  ;;  %v1263_v34 = vld [vmem:[#allocation9 + $0xa0] sm:$0xff]  ;;  %v1253_v36 = vld [vmem:[#allocation9 + $0x50] sm:$0xff]  ;;  %v1262_v38 = vld [vmem:[#allocation9 + $0x98] sm:$0xff] }
  0x3a   :  { %v1244_v44 = vld [vmem:[#allocation9 + $0x8] sm:$0xff]  ;;  %v1261_v50 = vld [vmem:[#allocation9 + $0x90] sm:$0xff]  ;;  %v1243_v51 = vld [vmem:[#allocation9] sm:$0xff] }
  0x3b   :  { %472 = vmatpush.bf16.msrb.mxu0 %v1075_v39  ;;  %v1252_v45 = vld [vmem:[#allocation9 + $0x48] sm:$0xff]  ;;  %v1251_v52 = vld [vmem:[#allocation9 + $0x40] sm:$0xff] }
  0x3c   :  { %486 = vmatpush.bf16.msrb.mxu1 %v1079_v40  ;;  %v1259_v63 = vld [vmem:[#allocation9 + $0x80] sm:$0xff] }
  0x3d   :  { %464 = vmatpush.bf16.msra.mxu3 %v999_v54  ;;  %823 = vmatpush.bf16.msrb.mxu2 %v1249_v19  ;;  %v1260_v54 = vld [vmem:[#allocation9 + $0x88] sm:$0xff] }
  0x3f   :  { %473 = vmatpush.bf16.msrb.mxu0 %v1063_v48 }
  0x40   :  { %487 = vmatpush.bf16.msrb.mxu1 %v1067_v49  ;;  %465 = vmatmul.bf16.vlgmr.msra.gmra.mxu3 %v1478_v31 }
  0x41   :  { %836 = vmatpush.bf16.msrb.mxu3 %v1258_v18  ;;  %824 = vmatpush.bf16.msrb.mxu2 %v1248_v22 }
  0x43   :  { %474 = vmatpush.bf16.msrb.mxu0 %v1051_v55 }
  0x44   :  { %488 = vmatpush.bf16.msrb.mxu1 %v1055_v56 }
  0x45   :  { %837 = vmatpush.bf16.msrb.mxu3 %v1257_v20  ;;  %825 = vmatpush.bf16.msrb.mxu2 %v1247_v25 }
  0x47   :  { %475 = vmatpush.bf16.msrb.mxu0 %v1039_v61 }
  0x48   :  { %489 = vmatpush.bf16.msrb.mxu1 %v1043_v62 }
  0x49   :  { %838 = vmatpush.bf16.msrb.mxu3 %v1256_v23 }
  0x4b   :  { %476 = vmatpush.bf16.msrb.mxu0 %v1027_v3 }
  0x4c   :  { %490 = vmatpush.bf16.msrb.mxu1 %v1031_v4 }
  0x4d   :  { %839 = vmatpush.bf16.msrb.mxu3 %v1255_v26 }
  0x4f   :  { %477 = vmatpush.bf16.msrb.mxu0 %v1015_v9 }
  0x50   :  { %491 = vmatpush.bf16.msrb.mxu1 %v1019_v10 }
  0x51   :  { %840 = vmatpush.bf16.msrb.mxu3 %v1254_v32 }
  0x53   :  { %478 = vmatpush.bf16.msrb.mxu0 %v1003_v15 }
  0x54   :  { %492 = vmatpush.bf16.msrb.mxu1 %v1007_v16 }
  0x55   :  { %841 = vmatpush.bf16.msrb.mxu3 %v1253_v36 }
  0x56   :  { %479 = vmatmul.bf16.vlgmr.msrb.gmra.mxu0 %v1478_v31 }
  0x57   :  { %493 = vmatmul.bf16.vlgmr.msrb.gmra.mxu1 %v1478_v31  ;;  %850 = vmatpush.bf16.msra.mxu0 %v1266_v21  ;;  %v1246_v31 = vld [vmem:[#allocation9 + $0x18] sm:$0xff] }
  0x58   :  { %826 = vmatpush.bf16.msrb.mxu2 %v1246_v31 }
  0x59   :  { %842 = vmatpush.bf16.msrb.mxu3 %v1252_v45 }
  0x5b   :  { %851 = vmatpush.bf16.msra.mxu0 %v1265_v24 }
  0x5c   :  { %827 = vmatpush.bf16.msrb.mxu2 %v1245_v35 }
  0x5d   :  { %843 = vmatpush.bf16.msrb.mxu3 %v1251_v52 }
  0x5f   :  { %852 = vmatpush.bf16.msra.mxu0 %v1264_v27 }
  0x60   :  { %828 = vmatpush.bf16.msrb.mxu2 %v1244_v44 }
  0x63   :  { %853 = vmatpush.bf16.msra.mxu0 %v1263_v34 }
  0x64   :  { %829 = vmatpush.bf16.msrb.mxu2 %v1243_v51 }
  0x67   :  { %854 = vmatpush.bf16.msra.mxu0 %v1262_v38 }
  0x6b   :  { %855 = vmatpush.bf16.msra.mxu0 %v1261_v50 }
  0x6f   :  { %856 = vmatpush.bf16.msra.mxu0 %v1260_v54 }
  0x73   :  { %857 = vmatpush.bf16.msra.mxu0 %v1259_v63 }
  0xb3   :  { %v1486_v28 = vpop.f32.mrf.mxu0 }
  0xb4   :  { %v1092_v29 = vmul.f32 -1.442695, %v1486_v28  ;;  %v1489_v30 = vpop.f32.mrf.mxu1 }
  0xb5   :  { %v1093_v33 = vmul.f32 -1.442695, %v1489_v30 }
  0xb6   :  { %1278 = vpow2.f32 %v1092_v29 }
  0xb7   :  { %1280 = vpow2.f32 %v1093_v33 }
  0xbb   :  { %v1492_v37 = vpop.f32.mrf.mxu2  ;;  %v1495_v40 = vpop.f32.mrf.mxu0 }
  0xbc   :  { %v1094_v39 = vmul.f32 -1.442695, %v1492_v37  ;;  %v1279_v41 = vpop.eup %1278  ;;  %v1095_v42 = vmul.f32 -1.442695, %v1495_v40  ;;  %v1498_v43 = vpop.f32.mrf.mxu1 }
  0xbd   :  { %v1281_v46 = vpop.eup %1280  ;;  %v517_v47 = vadd.f32 1.0, %v1279_v41  ;;  %v1096_v48 = vmul.f32 -1.442695, %v1498_v43 }
  0xbe   :  { %1282 = vpow2.f32 %v1094_v39  ;;  %v1501_v49 = vadd.f32 1.0, %v1281_v46 }
  0xbf   :  { %1284 = vpow2.f32 %v1095_v42  ;;  %v532_v7 = vand.u32 2147483647, %v517_v47  ;;  %v534_v8 = vand.u32 2147483648, %v517_v47  ;;  %vm528_vm1 = vweird.f32 %v517_v47 }
  0xc0   :  { %1286 = vrcp.f32 %v517_v47  ;;  %v547_v12 = vand.u32 2147483647, %v1501_v49  ;;  %vm543_vm2 = vweird.f32 %v1501_v49  ;;  %v549_v15 = vand.u32 2147483648, %v1501_v49 }
  0xc1   :  { %1288 = vrcp.f32 %v1501_v49  ;;  %vm1534_vm4 = vcmp.eq.f32.partialorder %v532_v7, 8.507059e+37  ;;  %v535_v19 = vor.u32 1.1754944e-38, %v534_v8 }
  0xc2   :  { %1290 = vpow2.f32 %v1096_v48  ;;  %vm1544_vm6 = vcmp.eq.f32.partialorder %v547_v12, 8.507059e+37  ;;  %v550_v32 = vor.u32 1.1754944e-38, %v549_v15 }
  0xc3   :  { %v1504_v53 = vpop.f32.mrf.mxu2  ;;  %v466_v25 = vpop.f32.mrf.mxu3 }
  0xc4   :  { %v1283_v55 = vpop.eup %1282  ;;  %v1097_v56 = vmul.f32 -1.442695, %v1504_v53 }
  0xc5   :  { %v1285_v57 = vpop.eup %1284  ;;  %v1507_v58 = vadd.f32 1.0, %v1283_v55 }
  0xc6   :  { %v1287_v59 = vpop.eup %1286  ;;  %v1509_v60 = vadd.f32 1.0, %v1285_v57  ;;  %1292 = vpow2.f32 %v1097_v56 }
  0xc7   :  { %v1511_v61 = vpop.eup %1288  ;;  %v524_v62 = vmul.f32 %v1287_v59, %v517_v47  ;;  %1294 = vrcp.f32 %v1507_v58  ;;  %vm529_vm0 = vweird.f32 %v1287_v59  ;;  %vm558_vm7 = vweird.f32 %v1507_v58 }
  0xc8   :  { %v1291_v0 = vpop.eup %1290  ;;  %v539_v1 = vmul.f32 %v1511_v61, %v1501_v49  ;;  %1296 = vrcp.f32 %v1509_v60  ;;  %vm1530_vm3 = vmor %vm528_vm1, %vm529_vm0  ;;  %vm544_vm5 = vweird.f32 %v1511_v61  ;;  %v577_v24 = vand.u32 2147483647, %v1509_v60 }
  0xc9   :  { %v525_v2 = vsub.f32 1.0, %v524_v62  ;;  %v1517_v5 = vadd.f32 1.0, %v1291_v0  ;;  %v579_v29 = vand.u32 2147483648, %v1509_v60  ;;  %v562_v34 = vand.u32 2147483647, %v1507_v58  ;;  %vm1557_vm8 = vmor %vm543_vm2, %vm544_vm5 }
  0xca   :  { %v540_v3 = vsub.f32 1.0, %v539_v1  ;;  %v564_v44 = vand.u32 2147483648, %v1507_v58  ;;  %vm573_vm10 = vweird.f32 %v1509_v60  ;;  %vm1567_vm11 = vcmp.eq.f32.partialorder %v577_v24, 8.507059e+37 }
  0xcb   :  { %v526_v4 = vmul.f32 %v1287_v59, %v525_v2  ;;  %1298 = vrcp.f32 %v1517_v5  ;;  %v580_v47 = vor.u32 1.1754944e-38, %v579_v29  ;;  %v592_v49 = vand.u32 2147483647, %v1517_v5 }
  0xcc   :  { %v1293_v6 = vpop.eup %1292  ;;  %v541_v11 = vmul.f32 %v1511_v61, %v540_v3  ;;  %v594_v52 = vand.u32 2147483648, %v1517_v5  ;;  %vm1578_vm15 = vcmp.eq.f32.partialorder %v562_v34, 8.507059e+37  ;;  %vm588_vm1 = vweird.f32 %v1517_v5 }
  0xcd   :  { %v1519_v9 = vpop.eup %1294  ;;  %v527_v10 = vadd.f32 %v1287_v59, %v526_v4  ;;  %v1528_v16 = vadd.f32 1.0, %v1293_v6  ;;  %vm593_vm2 = vcmp.eq.f32.partialorder %v592_v49, 8.507059e+37  ;;  %v468_v6 = vpop.f32.mrf.mxu3 }
  0xce   :  { %v554_v13 = vmul.f32 %v1519_v9, %v1507_v58  ;;  %v1297_v14 = vpop.eup %1296  ;;  %v542_v23 = vadd.f32 %v1511_v61, %v541_v11  ;;  %vm559_vm12 = vweird.f32 %v1519_v9  ;;  %v595_v4 = vor.u32 1.1754944e-38, %v594_v52 }
  0xcf   :  { %v569_v21 = vmul.f32 %v1297_v14, %v1509_v60  ;;  %v531_v22 = vsel %vm1530_vm3, %v1287_v59, %v527_v10  ;;  %1300 = vrcp.f32 %v1528_v16  ;;  %vm574_vm9 = vweird.f32 %v1297_v14  ;;  %vm1587_vm0 = vmor %vm558_vm7, %vm559_vm12 }
  0xd0   :  { %v555_v20 = vsub.f32 1.0, %v554_v13  ;;  %v536_v36 = vsel %vm1534_vm4, %v535_v19, %v531_v22  ;;  %v546_v42 = vsel %vm1557_vm8, %v1511_v61, %v542_v23  ;;  %vm575_vm13 = vmor %vm573_vm10, %vm574_vm9  ;;  %v565_v60 = vor.u32 1.1754944e-38, %v564_v44 }
  0xd1   :  { %v570_v27 = vsub.f32 1.0, %v569_v21  ;;  %v1299_v31 = vpop.eup %1298  ;;  %v613_v50 = vmul.f32 %v536_v36, %v1486_v28  ;;  %v551_v55 = vsel %vm1544_vm6, %v550_v32, %v546_v42  ;;  %v609_v8 = vand.u32 2147483648, %v1528_v16 }
  0xd2   :  { %v556_v33 = vmul.f32 %v1519_v9, %v555_v20  ;;  %v584_v41 = vmul.f32 %v1299_v31, %v1517_v5  ;;  %vm589_vm14 = vweird.f32 %v1299_v31  ;;  %v614_v2 = vmul.f32 %v551_v55, %v1489_v30 }
  0xd3   :  { %v480_v35 = vpop.f32.mrf.mxu0  ;;  %v571_v39 = vmul.f32 %v1297_v14, %v570_v27  ;;  %vm590_vm3 = vmor %vm588_vm1, %vm589_vm14  ;;  %v619_v10 = vmul.f32 %v613_v50, %v466_v25  ;;  %v607_v5 = vand.u32 2147483647, %v1528_v16  ;;  %vm603_vm5 = vweird.f32 %v1528_v16 }
  0xd4   :  { %v585_v48 = vsub.f32 1.0, %v584_v41  ;;  %v557_v51 = vadd.f32 %v1519_v9, %v556_v33  ;;  %v494_v1 = vpop.f32.mrf.mxu1  ;;  %v610_v17 = vor.u32 1.1754944e-38, %v609_v8  ;;  %v620_v18 = vmul.f32 %v614_v2, %v480_v35 }
  0xd5   :  { %v572_v46 = vadd.f32 %v1297_v14, %v571_v39  ;;  %v1301_v54 = vpop.eup %1300  ;;  %vm608_vm7 = vcmp.eq.f32.partialorder %v607_v5, 8.507059e+37 }
  0xd6   :  { %v586_v57 = vmul.f32 %v1299_v31, %v585_v48  ;;  %v599_v61 = vmul.f32 %v1301_v54, %v1528_v16  ;;  %v561_v3 = vsel %vm1587_vm0, %v1519_v9, %v557_v51  ;;  %vm604_vm4 = vweird.f32 %v1301_v54 }
  0xd7   :  { %v576_v56 = vsel %vm575_vm13, %v1297_v14, %v572_v46  ;;  %v566_v30 = vsel %vm1578_vm15, %v565_v60, %v561_v3  ;;  %vm605_vm6 = vmor %vm603_vm5, %vm604_vm4 }
  0xd8   :  { %v581_v28 = vsel %vm1567_vm11, %v580_v47, %v576_v56  ;;  %v587_v0 = vadd.f32 %v1299_v31, %v586_v57  ;;  %v600_v58 = vsub.f32 1.0, %v599_v61  ;;  %v615_v20 = vmul.f32 %v566_v30, %v1492_v37 }
  0xd9   :  { %v616_v63 = vmul.f32 %v581_v28, %v1495_v40 }
  0xda   :  { %v591_v7 = vsel %vm590_vm3, %v1299_v31, %v587_v0  ;;  %v601_v12 = vmul.f32 %v1301_v54, %v600_v58 }
  0xdb   :  { %v622_v40 = vmul.f32 %v616_v63, %v468_v6  ;;  %v596_v11 = vsel %vm593_vm2, %v595_v4, %v591_v7  ;;  %v482_v13 = vpop.f32.mrf.mxu0 }
  0xdc   :  { %v617_v9 = vmul.f32 %v596_v11, %v1498_v43  ;;  %v602_v15 = vadd.f32 %v1301_v54, %v601_v12  ;;  %v496_v25 = vpop.f32.mrf.mxu1  ;;  %v621_v43 = vmul.f32 %v615_v20, %v494_v1 }
  0xdd   :  { %v627_v14 = vpack.c.bf16 %v622_v40, %v619_v10 }
  0xde   :  { %v623_v19 = vmul.f32 %v617_v9, %v482_v13  ;;  %v606_v21 = vsel %vm605_vm6, %v1301_v54, %v602_v15 }
  0xdf   :  { %830 = vmatmul.bf16.vlgmr.msrb.gmra.mxu2 %v627_v14  ;;  %v611_v22 = vsel %vm608_vm7, %v610_v17, %v606_v21 }
  0xe0   :  { %v628_v23 = vpack.c.bf16 %v623_v19, %v620_v18  ;;  %v618_v24 = vmul.f32 %v611_v22, %v1504_v53 }
  0xe2   :  { %844 = vmatmul.bf16.vlgmr.msrb.gmra.mxu3 %v628_v23  ;;  %v624_v26 = vmul.f32 %v618_v24, %v496_v25 }
  0xe4   :  { %v629_v27 = vpack.c.bf16 %v624_v26, %v621_v43 }
  0xe6   :  { %858 = vmatmul.bf16.vlgmr.msra.gmra.mxu0 %v629_v27 }
 0x162   :  { %v831_v16 = vpop.f32.mrf.mxu2 }
 0x163   :  { %v859_v31 = vpop.f32.mrf.mxu0 }
 0x165   :  { %v845_v29 = vpop.f32.mrf.mxu3 }
 0x166   :  { %v846_v32 = vadd.f32 %v845_v29, %v831_v16 }
 0x168   :  { %v860_v33 = vadd.f32 %v859_v31, %v846_v32 }
 0x16a   :  { %873 = vst [vmem:[#allocation11] sm:$0xff] %v860_v33  ;;  %v833_v34 = vpop.f32.mrf.mxu2 }
 0x16b   :  { %v861_v35 = vpop.f32.mrf.mxu0 }
 0x16d   :  { %v847_v37 = vpop.f32.mrf.mxu3 }
 0x16e   :  { %v848_v53 = vadd.f32 %v847_v37, %v833_v34 }
 0x170   :  { %v862_v36 = vadd.f32 %v861_v35, %v848_v53 }
 0x172   :  { %874 = vst [vmem:[#allocation11 + $0x8] sm:$0xff] %v862_v36 }
 0x173   :  { %887 = dma.vmem_to_hbm [thread:$0]  %s880_s3, 256, %s882_s13, [#allocation5], %s1439_s14, %s1439_s14, %s1440_s15  }
 0x174   :  { %1428 = dma.done.wait [#allocation5], 256  }
 0x175   :  { %1429 = vsyncadd [#allocation5], 4294967040 }
 0x176   :  { %892 = vsyncpa [#allocation4], 1 }
 0x177   :  { %893 = vsyncpa [#allocation7], 1 }
 0x178   :  { %894 = vsyncpa [#allocation10], 1 }
 0x179   :  { %895 = vsyncpa [#allocation5], 1 }

</bundles_post_ra>
